<compile_context>
chip_gen: v5e
topology: v5e:2x2
jax: 0.10.0
libtpu: 0.0.40
codegen_flags: <defaults>
</compile_context>

<pallas_src>
import functools

import jax
import jax.numpy as jnp
import numpy as np
from jax.experimental import pallas as pl
from jax.experimental.pallas import tpu as pltpu

EPS = 1e-5


# --------------------------------------------------------------------------------------
# Kernel
# --------------------------------------------------------------------------------------
def _conv_relu_bn(x2d, m_ref, b_ref, g_ref, beta_ref, taps, *, W, NH, matmul_dtype):
    """conv('same') -> bias -> ReLU -> train-mode BN on a lane-folded (NH, W*Cin) activation.

    The K row taps are lane-concatenated into one (NH, K*W*Cin) operand and contracted
    against one pre-folded (K*W*Cin, W*Cout) weight: a single deep MXU matmul per layer.
    """
    WCout = m_ref.shape[1]
    Cout = WCout // W

    parts = []
    for dh, pad_mask in taps:
        if dh == 0:
            xs = x2d
        else:
            xs = pltpu.roll(x2d, shift=(-dh) % NH, axis=0)   # XLU slot, near-free
            xs = jnp.where(pad_mask, 0.0, xs)                # zero rows outside the image
        parts.append(xs)
    xcat = jnp.concatenate(parts, axis=1).astype(matmul_dtype)        # (NH, K*W*Cin)

    # Single deep matmul, f32 accumulation on the MXU.
    acc = jnp.dot(xcat, m_ref[...], preferred_element_type=jnp.float32)  # (NH, W*Cout)

    # bias + ReLU in f32 (bias/gamma/beta are lane-tiled to (1, W*Cout) in the wrapper).
    y = jnp.maximum(acc + b_ref[...], 0.0)

    # One-pass BN statistics: pack [column sums ; column sums-of-squares] into one
    # (2, W*Cout) array so each wrap-around lane roll of the butterfly moves both rows.
    # After log2(W) rolls every lane holds the full per-channel sums, already replicated
    # per W group.
    s = jnp.concatenate([jnp.sum(y, axis=0, keepdims=True),
                         jnp.sum(y * y, axis=0, keepdims=True)], axis=0)  # (2, W*Cout)
    step = Cout
    while step < WCout:                      # requires W to be a power of two
        s = s + pltpu.roll(s, shift=step, axis=1)
        step *= 2
    inv_n = 1.0 / float(NH * W)
    mean = s[0:1, :] * inv_n
    var = jnp.maximum(s[1:2, :] * inv_n - mean * mean, 0.0)  # biased batch var, clamped
    scale = g_ref[...] * jax.lax.rsqrt(var + EPS)
    shift = beta_ref[...] - mean * scale
    return y * scale + shift                 # single FMA normalize pass


def double_conv_kernel(x_ref, m1_ref, b1_ref, g1_ref, beta1_ref,
                       m2_ref, b2_ref, g2_ref, beta2_ref, out_ref,
                       *, H, W, K, padding, matmul_dtype):
    NH = x_ref.shape[0]

    # Hoisted once, shared by both layers: in-image row index + zero-padding masks per tap.
    h_idx = jax.lax.broadcasted_iota(jnp.int32, (NH, 1), 0) % H
    taps = []
    for kh in range(K):
        dh = kh - padding
        if dh == 0:
            taps.append((0, None))
        elif dh < 0:
            taps.append((dh, h_idx < -dh))        # first |dh| rows of each image
        else:
            taps.append((dh, h_idx >= H - dh))    # last dh rows of each image

    y1 = _conv_relu_bn(x_ref[...].astype(jnp.float32), m1_ref, b1_ref, g1_ref, beta1_ref,
                       taps, W=W, NH=NH, matmul_dtype=matmul_dtype)
    y2 = _conv_relu_bn(y1, m2_ref, b2_ref, g2_ref, beta2_ref,
                       taps, W=W, NH=NH, matmul_dtype=matmul_dtype)
    out_ref[...] = y2.astype(out_ref.dtype)       # (N*H, W*Cout): lane-dense, unmasked vst


# --------------------------------------------------------------------------------------
# Parameter folding (off the per-call path: call once per parameter update)
# --------------------------------------------------------------------------------------
def _fold_weight(w_oihw, W, padding, matmul_dtype):
    """(Cout, Cin, K, K) conv weight -> (K*W*Cin, W*Cout) tap-concatenated block-banded matrix.

    M[kh*W*Cin + wi*Cin + ci, wo*Cout + co] = w[co, ci, kh, kw] with wi = wo + kw - padding,
    zero outside the band (implements zero padding along W).  kh blocks are stacked along the
    contraction axis so the kernel does ONE deep matmul per layer.
    """
    Cout, Cin, K, _ = w_oihw.shape
    w = jnp.transpose(w_oihw, (2, 3, 1, 0)).astype(jnp.float32)      # (K, K, Cin, Cout) HWIO
    sel = np.zeros((K, W, W), np.float32)
    for kw in range(K):
        for wo in range(W):
            wi = wo + kw - padding
            if 0 <= wi < W:
                sel[kw, wi, wo] = 1.0
    m = jnp.einsum("hwio,wvu->hviuo", w, jnp.asarray(sel))           # (K, W, Cin, W, Cout)
    # TODO(synk): above W~32 or large C, switch to per-kw lane-rolled matmuls against dense
    # (Cin, Cout) weights to avoid the O(W^2) weight blow-up and zero-MAC work.
    return m.reshape(K * W * Cin, W * Cout).astype(matmul_dtype)


def fold_params(params, W, padding, matmul_dtype=jnp.bfloat16):
    """Precompute kernel operands (PyTorch-layout params in, kernel-layout operands out)."""
    Cout, _, K, _ = params["w1"].shape
    assert padding == (K - 1) // 2, "kernel implements 'same' convolution (padding=(K-1)//2)"
    # TODO(synk): general padding / even kernel sizes would need a different fold.
    assert W & (W - 1) == 0, "lane-group butterfly reduction assumes W is a power of two"
    tile = lambda v: jnp.tile(v.reshape(1, Cout).astype(jnp.float32), (1, W))  # (1, W*Cout)
    return dict(
        m1=_fold_weight(params["w1"], W, padding, matmul_dtype),
        b1=tile(params["b1"]), g1=tile(params["g1"]), beta1=tile(params["beta1"]),
        m2=_fold_weight(params["w2"], W, padding, matmul_dtype),
        b2=tile(params["b2"]), g2=tile(params["g2"]), beta2=tile(params["beta2"]),
        K=K, Cout=Cout, padding=padding, matmul_dtype=matmul_dtype,
    )


# --------------------------------------------------------------------------------------
# Wrapper
# --------------------------------------------------------------------------------------
def double_conv_block(x_nchw, folded):
    """x: (N, Cin, H, W) NCHW (PyTorch layout).  Returns (N, Cout, H, W)."""
    N, Cin, H, W = x_nchw.shape
    K, Cout, padding = folded["K"], folded["Cout"], folded["padding"]

    # Lane-fold: NCHW -> NHWC -> (N*H, W*Cin) so W*C sits on the 128-lane axis.
    x2d = jnp.transpose(x_nchw, (0, 2, 3, 1)).reshape(N * H, W * Cin)

    args = (x2d,
            folded["m1"], folded["b1"], folded["g1"], folded["beta1"],
            folded["m2"], folded["b2"], folded["g2"], folded["beta2"])

    # VMEM budget: operands + activations/intermediates, with 2x headroom (min 16 MiB,
    # capped at 64 MiB).  Only matters when the block is scaled up (esp. v7x, 64 MiB VMEM).
    est = sum(int(np.prod(a.shape)) * a.dtype.itemsize for a in args)
    est += N * H * W * Cout * 4 * 3 + N * H * K * W * Cout * 2 * 2
    vmem_limit = int(min(max(2 * est, 16 << 20), 64 << 20))

    vmem = pl.BlockSpec(memory_space=pltpu.MemorySpace.VMEM)
    out2d = pl.pallas_call(
        functools.partial(double_conv_kernel, H=H, W=W, K=K, padding=padding,
                          matmul_dtype=folded["matmul_dtype"]),
        out_shape=jax.ShapeDtypeStruct((N * H, W * Cout), jnp.float32),
        in_specs=[vmem] * len(args),
        out_specs=vmem,
        compiler_params=pltpu.CompilerParams(vmem_limit_bytes=vmem_limit),
    )(*args)
    # TODO(synk): once N*H grows past a few hundred rows, add a row-tiled grid
    # (dimension_semantics=("parallel",), weights resident) with a two-phase BN
    # (per-tile s1/s2 accumulation + finalize) so the kernel pipelines DMA and uses both
    # v7x TensorCores; at this shape the whole block fits in VMEM in one shot.
    return jnp.transpose(out2d.reshape(N, H, W, Cout), (0, 3, 1, 2))


# --------------------------------------------------------------------------------------
# Pure-JAX reference (PyTorch layouts, training-mode BN)
# --------------------------------------------------------------------------------------
def double_conv_ref(x, params, padding):
    def step(x, w, b, g, beta):
        y = jax.lax.conv_general_dilated(
            x, w, window_strides=(1, 1),
            padding=[(padding, padding), (padding, padding)],
            dimension_numbers=("NCHW", "OIHW", "NCHW"))
        y = y + b.reshape(1, -1, 1, 1)
        y = jnp.maximum(y, 0.0)
        mean = jnp.mean(y, axis=(0, 2, 3), keepdims=True)
        var = jnp.mean((y - mean) ** 2, axis=(0, 2, 3), keepdims=True)
        return (g.reshape(1, -1, 1, 1) * (y - mean) / jnp.sqrt(var + EPS)
                + beta.reshape(1, -1, 1, 1))

    y = step(x, params["w1"], params["b1"], params["g1"], params["beta1"])
    return step(y, params["w2"], params["b2"], params["g2"], params["beta2"])


if __name__ == "__main__":
    # DoubleConvBlock(in_channels=4, out_channels=8, kernel_size=3, padding=1,
    #                 has_relu=True, has_batch_norm=True), NCHW input.
    N, Cin, H, W, Cout, K, P = 2, 4, 16, 16, 8, 3, 1

    key = jax.random.PRNGKey(0)
    ks = jax.random.split(key, 9)
    x = jax.random.normal(ks[0], (N, Cin, H, W), jnp.float32)
    params = dict(
        w1=0.1 * jax.random.normal(ks[1], (Cout, Cin, K, K), jnp.float32),
        b1=0.1 * jax.random.normal(ks[2], (Cout,), jnp.float32),
        g1=1.0 + 0.1 * jax.random.normal(ks[3], (Cout,), jnp.float32),
        beta1=0.1 * jax.random.normal(ks[4], (Cout,), jnp.float32),
        w2=0.1 * jax.random.normal(ks[5], (Cout, Cout, K, K), jnp.float32),
        b2=0.1 * jax.random.normal(ks[6], (Cout,), jnp.float32),
        g2=1.0 + 0.1 * jax.random.normal(ks[7], (Cout,), jnp.float32),
        beta2=0.1 * jax.random.normal(ks[8], (Cout,), jnp.float32),
    )

    ref = double_conv_ref(x, params, P)

    # f32-operand path: validates the fused single-matmul formulation exactly.
    folded_f32 = fold_params(params, W, P, matmul_dtype=jnp.float32)
    out_f32 = double_conv_block(x, folded_f32)
    jax.block_until_ready(out_f32)
    assert out_f32.shape == (N, Cout, H, W)
    assert np.allclose(np.asarray(out_f32), np.asarray(ref), atol=1e-4, rtol=1e-4), (
        "f32 path mismatch vs reference")

    # bf16-operand MXU path (the performance configuration): looser tolerance by design.
    folded_bf16 = fold_params(params, W, P, matmul_dtype=jnp.bfloat16)
    out_bf16 = double_conv_block(x, folded_bf16)
    jax.block_until_ready(out_bf16)
    assert np.allclose(np.asarray(out_bf16), np.asarray(ref), atol=5e-2, rtol=5e-2), (
        "bf16 path mismatch vs reference")

    print("KERNEL_OK")
</pallas_src>

<mosaic_0001>
module attributes {stable_mosaic.version = 11 : i64} {
  func.func @double_conv_kernel(%arg0: memref<32x64xf32, #tpu.memory_space<vmem>>, %arg1: memref<192x128xf32, #tpu.memory_space<vmem>>, %arg2: memref<1x128xf32, #tpu.memory_space<vmem>>, %arg3: memref<1x128xf32, #tpu.memory_space<vmem>>, %arg4: memref<1x128xf32, #tpu.memory_space<vmem>>, %arg5: memref<384x128xf32, #tpu.memory_space<vmem>>, %arg6: memref<1x128xf32, #tpu.memory_space<vmem>>, %arg7: memref<1x128xf32, #tpu.memory_space<vmem>>, %arg8: memref<1x128xf32, #tpu.memory_space<vmem>>, %arg9: memref<32x128xf32, #tpu.memory_space<vmem>>) attributes {dimension_semantics = [], scalar_prefetch = 0 : i64, scratch_operands = 0 : i64, tpu.core_type = #tpu.core_type<tc>} {
    %0 = tpu.iota {dimensions = array<i32: 0>} : vector<32x1xi32>
    %c16_i32 = arith.constant 16 : i32
    %c0_i32 = arith.constant 0 : i32
    %1 = arith.cmpi eq, %c16_i32, %c0_i32 : i32
    %c1_i32 = arith.constant 1 : i32
    %2 = arith.select %1, %c1_i32, %c16_i32 : i32
    %3 = vector.broadcast %2 : i32 to vector<32x1xi32>
    %4 = arith.remsi %0, %3 : vector<32x1xi32>
    %c0_i32_0 = arith.constant 0 : i32
    %5 = vector.broadcast %c0_i32_0 : i32 to vector<32x1xi32>
    %6 = arith.cmpi ne, %4, %5 : vector<32x1xi32>
    %c0_i32_1 = arith.constant 0 : i32
    %7 = vector.broadcast %c0_i32_1 : i32 to vector<32x1xi32>
    %8 = arith.cmpi slt, %4, %7 : vector<32x1xi32>
    %c0_i32_2 = arith.constant 0 : i32
    %9 = arith.cmpi slt, %2, %c0_i32_2 : i32
    %10 = vector.broadcast %9 : i1 to vector<32x1xi1>
    %11 = vector.broadcast %10 : vector<32x1xi1> to vector<32x1xi1>
    %12 = arith.xori %8, %11 : vector<32x1xi1>
    %13 = arith.andi %12, %6 : vector<32x1xi1>
    %14 = vector.broadcast %2 : i32 to vector<32x1xi32>
    %15 = arith.addi %4, %14 : vector<32x1xi32>
    %16 = arith.select %13, %15, %4 : vector<32x1xi1>, vector<32x1xi32>
    %c1_i32_3 = arith.constant 1 : i32
    %17 = vector.broadcast %c1_i32_3 : i32 to vector<32x1xi32>
    %18 = arith.cmpi slt, %16, %17 : vector<32x1xi32>
    %c15_i32 = arith.constant 15 : i32
    %19 = vector.broadcast %c15_i32 : i32 to vector<32x1xi32>
    %20 = arith.cmpi sge, %16, %19 : vector<32x1xi32>
    %c0 = arith.constant 0 : index
    %c0_4 = arith.constant 0 : index
    %21 = vector.load %arg0[%c0, %c0_4] : memref<32x64xf32, #tpu.memory_space<vmem>>, vector<32x64xf32>
    %c1_i32_5 = arith.constant 1 : i32
    %22 = tpu.dynamic_rotate %21 by %c1_i32_5 dim 0 : vector<32x64xf32>, i32 -> vector<32x64xf32>
    %cst = arith.constant 0.000000e+00 : f32
    %23 = vector.shape_cast %18 : vector<32x1xi1> to vector<32x1xi1>
    %24 = vector.broadcast %23 : vector<32x1xi1> to vector<32x64xi1>
    %25 = vector.broadcast %cst : f32 to vector<32x64xf32>
    %26 = arith.select %24, %25, %22 : vector<32x64xi1>, vector<32x64xf32>
    %c31_i32 = arith.constant 31 : i32
    %27 = tpu.dynamic_rotate %21 by %c31_i32 dim 0 : vector<32x64xf32>, i32 -> vector<32x64xf32>
    %cst_6 = arith.constant 0.000000e+00 : f32
    %28 = vector.shape_cast %20 : vector<32x1xi1> to vector<32x1xi1>
    %29 = vector.broadcast %28 : vector<32x1xi1> to vector<32x64xi1>
    %30 = vector.broadcast %cst_6 : f32 to vector<32x64xf32>
    %31 = arith.select %29, %30, %27 : vector<32x64xi1>, vector<32x64xf32>
    %32 = tpu.concatenate %26, %21, %31 in 1 : vector<32x64xf32>, vector<32x64xf32>, vector<32x64xf32> -> vector<32x192xf32>
    %c0_7 = arith.constant 0 : index
    %c0_8 = arith.constant 0 : index
    %33 = vector.load %arg1[%c0_7, %c0_8] : memref<192x128xf32, #tpu.memory_space<vmem>>, vector<192x128xf32>
    %cst_9 = arith.constant dense<0.000000e+00> : vector<32x128xf32>
    %34 = tpu.matmul %32, %33, %cst_9 {dimension_numbers = #tpu.dot_dimension_numbers<[1], [0], [0], [1], [0, 0, 1, 1], [], []>} : vector<32x192xf32>, vector<192x128xf32>, vector<32x128xf32> -> vector<32x128xf32>
    %c0_10 = arith.constant 0 : index
    %c0_11 = arith.constant 0 : index
    %35 = vector.load %arg2[%c0_10, %c0_11] : memref<1x128xf32, #tpu.memory_space<vmem>>, vector<1x128xf32>
    %36 = vector.broadcast %35 : vector<1x128xf32> to vector<32x128xf32>
    %37 = arith.addf %34, %36 : vector<32x128xf32>
    %cst_12 = arith.constant 0.000000e+00 : f32
    %38 = vector.broadcast %cst_12 : f32 to vector<32x128xf32>
    %39 = arith.maximumf %37, %38 : vector<32x128xf32>
    %cst_13 = arith.constant dense<0.000000e+00> : vector<128xf32>
    %40 = vector.multi_reduction <add>, %39, %cst_13 [0] : vector<32x128xf32> to vector<128xf32>
    %41 = vector.shape_cast %40 : vector<128xf32> to vector<1x128xf32>
    %42 = arith.mulf %39, %39 : vector<32x128xf32>
    %cst_14 = arith.constant dense<0.000000e+00> : vector<128xf32>
    %43 = vector.multi_reduction <add>, %42, %cst_14 [0] : vector<32x128xf32> to vector<128xf32>
    %44 = vector.shape_cast %43 : vector<128xf32> to vector<1x128xf32>
    %45 = tpu.concatenate %41, %44 in 0 : vector<1x128xf32>, vector<1x128xf32> -> vector<2x128xf32>
    %c8_i32 = arith.constant 8 : i32
    %46 = tpu.dynamic_rotate %45 by %c8_i32 dim 1 : vector<2x128xf32>, i32 -> vector<2x128xf32>
    %47 = arith.addf %45, %46 : vector<2x128xf32>
    %c16_i32_15 = arith.constant 16 : i32
    %48 = tpu.dynamic_rotate %47 by %c16_i32_15 dim 1 : vector<2x128xf32>, i32 -> vector<2x128xf32>
    %49 = arith.addf %47, %48 : vector<2x128xf32>
    %c32_i32 = arith.constant 32 : i32
    %50 = tpu.dynamic_rotate %49 by %c32_i32 dim 1 : vector<2x128xf32>, i32 -> vector<2x128xf32>
    %51 = arith.addf %49, %50 : vector<2x128xf32>
    %c64_i32 = arith.constant 64 : i32
    %52 = tpu.dynamic_rotate %51 by %c64_i32 dim 1 : vector<2x128xf32>, i32 -> vector<2x128xf32>
    %53 = arith.addf %51, %52 : vector<2x128xf32>
    %54 = vector.extract_strided_slice %53 {offsets = [0, 0], sizes = [1, 128], strides = [1, 1]} : vector<2x128xf32> to vector<1x128xf32>
    %cst_16 = arith.constant 0.001953125 : f32
    %55 = vector.broadcast %cst_16 : f32 to vector<1x128xf32>
    %56 = arith.mulf %54, %55 : vector<1x128xf32>
    %57 = vector.extract_strided_slice %53 {offsets = [1, 0], sizes = [1, 128], strides = [1, 1]} : vector<2x128xf32> to vector<1x128xf32>
    %cst_17 = arith.constant 0.001953125 : f32
    %58 = vector.broadcast %cst_17 : f32 to vector<1x128xf32>
    %59 = arith.mulf %57, %58 : vector<1x128xf32>
    %60 = arith.mulf %56, %56 : vector<1x128xf32>
    %61 = arith.subf %59, %60 : vector<1x128xf32>
    %cst_18 = arith.constant 0.000000e+00 : f32
    %62 = vector.broadcast %cst_18 : f32 to vector<1x128xf32>
    %63 = arith.maximumf %61, %62 : vector<1x128xf32>
    %c0_19 = arith.constant 0 : index
    %c0_20 = arith.constant 0 : index
    %64 = vector.load %arg3[%c0_19, %c0_20] : memref<1x128xf32, #tpu.memory_space<vmem>>, vector<1x128xf32>
    %cst_21 = arith.constant 9.99999974E-6 : f32
    %65 = vector.broadcast %cst_21 : f32 to vector<1x128xf32>
    %66 = arith.addf %63, %65 : vector<1x128xf32>
    %67 = math.rsqrt %66 : vector<1x128xf32>
    %68 = arith.mulf %64, %67 : vector<1x128xf32>
    %c0_22 = arith.constant 0 : index
    %c0_23 = arith.constant 0 : index
    %69 = vector.load %arg4[%c0_22, %c0_23] : memref<1x128xf32, #tpu.memory_space<vmem>>, vector<1x128xf32>
    %70 = arith.mulf %56, %68 : vector<1x128xf32>
    %71 = arith.subf %69, %70 : vector<1x128xf32>
    %72 = vector.broadcast %68 : vector<1x128xf32> to vector<32x128xf32>
    %73 = arith.mulf %39, %72 : vector<32x128xf32>
    %74 = vector.broadcast %71 : vector<1x128xf32> to vector<32x128xf32>
    %75 = arith.addf %73, %74 : vector<32x128xf32>
    %c1_i32_24 = arith.constant 1 : i32
    %76 = tpu.dynamic_rotate %75 by %c1_i32_24 dim 0 : vector<32x128xf32>, i32 -> vector<32x128xf32>
    %cst_25 = arith.constant 0.000000e+00 : f32
    %77 = vector.shape_cast %18 : vector<32x1xi1> to vector<32x1xi1>
    %78 = vector.broadcast %77 : vector<32x1xi1> to vector<32x128xi1>
    %79 = vector.broadcast %cst_25 : f32 to vector<32x128xf32>
    %80 = arith.select %78, %79, %76 : vector<32x128xi1>, vector<32x128xf32>
    %c31_i32_26 = arith.constant 31 : i32
    %81 = tpu.dynamic_rotate %75 by %c31_i32_26 dim 0 : vector<32x128xf32>, i32 -> vector<32x128xf32>
    %cst_27 = arith.constant 0.000000e+00 : f32
    %82 = vector.shape_cast %20 : vector<32x1xi1> to vector<32x1xi1>
    %83 = vector.broadcast %82 : vector<32x1xi1> to vector<32x128xi1>
    %84 = vector.broadcast %cst_27 : f32 to vector<32x128xf32>
    %85 = arith.select %83, %84, %81 : vector<32x128xi1>, vector<32x128xf32>
    %86 = tpu.concatenate %80, %75, %85 in 1 : vector<32x128xf32>, vector<32x128xf32>, vector<32x128xf32> -> vector<32x384xf32>
    %c0_28 = arith.constant 0 : index
    %c0_29 = arith.constant 0 : index
    %87 = vector.load %arg5[%c0_28, %c0_29] : memref<384x128xf32, #tpu.memory_space<vmem>>, vector<384x128xf32>
    %cst_30 = arith.constant dense<0.000000e+00> : vector<32x128xf32>
    %88 = tpu.matmul %86, %87, %cst_30 {dimension_numbers = #tpu.dot_dimension_numbers<[1], [0], [0], [1], [0, 0, 1, 1], [], []>} : vector<32x384xf32>, vector<384x128xf32>, vector<32x128xf32> -> vector<32x128xf32>
    %c0_31 = arith.constant 0 : index
    %c0_32 = arith.constant 0 : index
    %89 = vector.load %arg6[%c0_31, %c0_32] : memref<1x128xf32, #tpu.memory_space<vmem>>, vector<1x128xf32>
    %90 = vector.broadcast %89 : vector<1x128xf32> to vector<32x128xf32>
    %91 = arith.addf %88, %90 : vector<32x128xf32>
    %cst_33 = arith.constant 0.000000e+00 : f32
    %92 = vector.broadcast %cst_33 : f32 to vector<32x128xf32>
    %93 = arith.maximumf %91, %92 : vector<32x128xf32>
    %cst_34 = arith.constant dense<0.000000e+00> : vector<128xf32>
    %94 = vector.multi_reduction <add>, %93, %cst_34 [0] : vector<32x128xf32> to vector<128xf32>
    %95 = vector.shape_cast %94 : vector<128xf32> to vector<1x128xf32>
    %96 = arith.mulf %93, %93 : vector<32x128xf32>
    %cst_35 = arith.constant dense<0.000000e+00> : vector<128xf32>
    %97 = vector.multi_reduction <add>, %96, %cst_35 [0] : vector<32x128xf32> to vector<128xf32>
    %98 = vector.shape_cast %97 : vector<128xf32> to vector<1x128xf32>
    %99 = tpu.concatenate %95, %98 in 0 : vector<1x128xf32>, vector<1x128xf32> -> vector<2x128xf32>
    %c8_i32_36 = arith.constant 8 : i32
    %100 = tpu.dynamic_rotate %99 by %c8_i32_36 dim 1 : vector<2x128xf32>, i32 -> vector<2x128xf32>
    %101 = arith.addf %99, %100 : vector<2x128xf32>
    %c16_i32_37 = arith.constant 16 : i32
    %102 = tpu.dynamic_rotate %101 by %c16_i32_37 dim 1 : vector<2x128xf32>, i32 -> vector<2x128xf32>
    %103 = arith.addf %101, %102 : vector<2x128xf32>
    %c32_i32_38 = arith.constant 32 : i32
    %104 = tpu.dynamic_rotate %103 by %c32_i32_38 dim 1 : vector<2x128xf32>, i32 -> vector<2x128xf32>
    %105 = arith.addf %103, %104 : vector<2x128xf32>
    %c64_i32_39 = arith.constant 64 : i32
    %106 = tpu.dynamic_rotate %105 by %c64_i32_39 dim 1 : vector<2x128xf32>, i32 -> vector<2x128xf32>
    %107 = arith.addf %105, %106 : vector<2x128xf32>
    %108 = vector.extract_strided_slice %107 {offsets = [0, 0], sizes = [1, 128], strides = [1, 1]} : vector<2x128xf32> to vector<1x128xf32>
    %cst_40 = arith.constant 0.001953125 : f32
    %109 = vector.broadcast %cst_40 : f32 to vector<1x128xf32>
    %110 = arith.mulf %108, %109 : vector<1x128xf32>
    %111 = vector.extract_strided_slice %107 {offsets = [1, 0], sizes = [1, 128], strides = [1, 1]} : vector<2x128xf32> to vector<1x128xf32>
    %cst_41 = arith.constant 0.001953125 : f32
    %112 = vector.broadcast %cst_41 : f32 to vector<1x128xf32>
    %113 = arith.mulf %111, %112 : vector<1x128xf32>
    %114 = arith.mulf %110, %110 : vector<1x128xf32>
    %115 = arith.subf %113, %114 : vector<1x128xf32>
    %cst_42 = arith.constant 0.000000e+00 : f32
    %116 = vector.broadcast %cst_42 : f32 to vector<1x128xf32>
    %117 = arith.maximumf %115, %116 : vector<1x128xf32>
    %c0_43 = arith.constant 0 : index
    %c0_44 = arith.constant 0 : index
    %118 = vector.load %arg7[%c0_43, %c0_44] : memref<1x128xf32, #tpu.memory_space<vmem>>, vector<1x128xf32>
    %cst_45 = arith.constant 9.99999974E-6 : f32
    %119 = vector.broadcast %cst_45 : f32 to vector<1x128xf32>
    %120 = arith.addf %117, %119 : vector<1x128xf32>
    %121 = math.rsqrt %120 : vector<1x128xf32>
    %122 = arith.mulf %118, %121 : vector<1x128xf32>
    %c0_46 = arith.constant 0 : index
    %c0_47 = arith.constant 0 : index
    %123 = vector.load %arg8[%c0_46, %c0_47] : memref<1x128xf32, #tpu.memory_space<vmem>>, vector<1x128xf32>
    %124 = arith.mulf %110, %122 : vector<1x128xf32>
    %125 = arith.subf %123, %124 : vector<1x128xf32>
    %126 = vector.broadcast %122 : vector<1x128xf32> to vector<32x128xf32>
    %127 = arith.mulf %93, %126 : vector<32x128xf32>
    %128 = vector.broadcast %125 : vector<1x128xf32> to vector<32x128xf32>
    %129 = arith.addf %127, %128 : vector<32x128xf32>
    %c0_48 = arith.constant 0 : index
    %c0_49 = arith.constant 0 : index
    %130 = vector.load %arg9[%c0_48, %c0_49] : memref<32x128xf32, #tpu.memory_space<vmem>>, vector<32x128xf32>
    tpu.vector_store %arg9[%c0_48, %c0_49], %129 {strides = array<i32>} : memref<32x128xf32, #tpu.memory_space<vmem>>, vector<32x128xf32>,
    return
  }
}

</mosaic_0001>

<bundles_post_ra>
// kernel: tpu_custom_call.1
= control target key start
LH: loop header
LB: loop body
LE: loop exit
PB: predicated region body
PF: predicated region fallthrough
CT: control target
= control target key end

     0   :  { %14 = vsyncpa [#allocation3], 0  ;;  %s1064_s0 = inlined_call_operand.hbm [shape: f32[32,64], index: 0, kind: input, shape index: {}]   ;;  %s1065_s1 = inlined_call_operand.hbm [shape: f32[192,128], index: 1, kind: input, shape index: {}]   ;;  %s1066_s2 = inlined_call_operand.vmem [shape: f32[1,128], index: 2, kind: input, shape index: {}]   ;;  %s1067_s3 = inlined_call_operand.vmem [shape: f32[1,128], index: 3, kind: input, shape index: {}]   ;;  %s1068_s4 = inlined_call_operand.vmem [shape: f32[1,128], index: 4, kind: input, shape index: {}]   ;;  %s1069_s5 = inlined_call_operand.hbm [shape: f32[384,128], index: 5, kind: input, shape index: {}]   ;;  %s1070_s6 = inlined_call_operand.vmem [shape: f32[1,128], index: 6, kind: input, shape index: {}]   ;;  %s1071_s7 = inlined_call_operand.vmem [shape: f32[1,128], index: 7, kind: input, shape index: {}]   ;;  %s1072_s8 = inlined_call_operand.vmem [shape: f32[1,128], index: 8, kind: input, shape index: {}]   ;;  %s1073_s9 = inlined_call_operand.hbm [shape: f32[32,128], index: 9, kind: output, shape index: {}]  }
   0x1   :  { %15 = vsyncpa [#allocation6], 0 }
   0x2   :  { %16 = vsyncpa [#allocation4], 0  ;;  %s34_s11 = sshll.u32 %s1065_s1, 4  ;;  %s801_s12 = smov [#allocation5]   ;;  %s35_s11 = int_to_ptr.hbm [resolvable:$true] %s34_s11 }
   0x3   :  { %s36_s13 = sshll.u32 %s801_s12, 4  ;;  %s21_s16 = sshll.u32 %s1064_s0, 4  ;;  %s37_s13 = int_to_ptr.vmem [resolvable:$true] %s36_s13  ;;  %s22_s16 = int_to_ptr.hbm [resolvable:$true] %s21_s16 }
   0x4   :  { %s802_s17 = smov 128   ;;  %s803_s18 = smov 8  }
   0x5   :  { %42 = dma.hbm_to_vmem [thread:$0]  %s35_s11, 3072, %s37_s13, [#allocation6], %s802_s17, %s802_s17, %s803_s18  }
   0x6   :  { %s804_s19 = smov [#allocation2]   ;;  %s53_s1 = sshll.u32 %s1069_s5, 4  ;;  %s54_s1 = int_to_ptr.hbm [resolvable:$true] %s53_s1 }
   0x7   :  { %s23_s20 = sshll.u32 %s804_s19, 4  ;;  %s805_s0 = smov [#allocation7]   ;;  %s24_s20 = int_to_ptr.vmem [resolvable:$true] %s23_s20 }
   0x8   :  { %29 = dma.hbm_to_vmem [thread:$0]  %s22_s16, 512, %s24_s20, [#allocation3], %s802_s17, %s802_s17, %s803_s18  }
   0x9   :  { %s55_s23 = sshll.u32 %s805_s0, 4  ;;  %s56_s23 = int_to_ptr.vmem [resolvable:$true] %s55_s23 }
   0xa   :  { %61 = dma.hbm_to_vmem [thread:$0]  %s54_s1, 6144, %s56_s23, [#allocation6], %s802_s17, %s802_s17, %s803_s18  }
   0xb   :  { %795 = dma.done.wait [#allocation3], 512  }
   0xc   :  { %796 = vsyncadd [#allocation3], 4294966784 }
   0xd   :  { %797 = dma.done.wait [#allocation6], 9216  }
   0xe   :  { %798 = vsyncadd [#allocation6], 4294958080  ;;  %v878_v0 = vld [vmem:[#allocation2] sm:$0xff]  ;;  %v880_v1 = vld [vmem:[#allocation2 + $0x10] sm:$0xff]  ;;  %s806_s5 = smov 64   ;;  %v80_v25 = vlaneseq  ;;  %vm203_vm2 = vcmask 523264  }
   0xf   :  { %191 = vrot.lane.b32.xlu0 %v878_v0, %s806_s5  ;;  %195 = vrot.lane.b32.xlu1 %v880_v1, %s806_s5  ;;  %v223_v2 = vld [vmem:[#allocation5 + $0x78] sm:$0xff]  ;;  %v222_v3 = vld [vmem:[#allocation5 + $0x70] sm:$0xff]  ;;  %v221_v4 = vld [vmem:[#allocation5 + $0x68] sm:$0xff]  ;;  %v145_v26 = vrot.slane %v878_v0, 7  ;;  %v166_v29 = vrot.slane %v878_v0, 1  ;;  %v147_v37 = vrot.slane %v880_v1, 7 }
  0x10   :  { %248 = vmatpush.msra.mxu0 %v223_v2  ;;  %v220_v5 = vld [vmem:[#allocation5 + $0x60] sm:$0xff]  ;;  %v231_v6 = vld [vmem:[#allocation5 + $0xb8] sm:$0xff]  ;;  %v886_v7 = vld [vmem:[#allocation2 + $0x8] sm:$0xff]  ;;  %v896_v28 = vshrl.u32 %v80_v25, 7  ;;  %v168_v38 = vrot.slane %v880_v1, 1  ;;  %vm332_vm7 = vcmask 1040384  }
  0x11   :  { %v888_v8 = vld [vmem:[#allocation2 + $0x18] sm:$0xff]  ;;  %285 = vmatpush.msra.mxu1 %v231_v6  ;;  %v230_v9 = vld [vmem:[#allocation5 + $0xb0] sm:$0xff]  ;;  %v229_v11 = vld [vmem:[#allocation5 + $0xa8] sm:$0xff]  ;;  %v167_v30 = vrot.slane %v886_v7, 1  ;;  %v146_v36 = vrot.slane %v886_v7, 7  ;;  %s808_s26 = smov 32  }
  0x12   :  { %249 = vmatpush.msra.mxu0 %v222_v3  ;;  %v219_v10 = vld [vmem:[#allocation5 + $0x58] sm:$0xff]  ;;  %v218_v12 = vld [vmem:[#allocation5 + $0x50] sm:$0xff]  ;;  %v228_v13 = vld [vmem:[#allocation5 + $0xa0] sm:$0xff]  ;;  %v148_v27 = vrot.slane %v888_v8, 7  ;;  %vm149_vm0 = vcmp.lt.s32.totalorder %v896_v28, 1  ;;  %vm170_vm1 = vcmp.lt.s32.totalorder %v896_v28, 7 }
  0x13   :  { %286 = vmatpush.msra.mxu1 %v230_v9  ;;  %v217_v14 = vld [vmem:[#allocation5 + $0x48] sm:$0xff]  ;;  %v227_v15 = vld [vmem:[#allocation5 + $0x98] sm:$0xff]  ;;  %v216_v16 = vld [vmem:[#allocation5 + $0x40] sm:$0xff]  ;;  %v173_v35 = vsel %vm170_vm1, %v166_v29, %v167_v30  ;;  %v82_v39 = vadd.s32 8, %v896_v28  ;;  %v152_v40 = vsel %vm149_vm0, %v145_v26, %v146_v36  ;;  %v172_v43 = vsel %vm170_vm1, %v167_v30, %v168_v38 }
  0x14   :  { %250 = vmatpush.msra.mxu0 %v221_v4  ;;  %v226_v17 = vld [vmem:[#allocation5 + $0x90] sm:$0xff]  ;;  %v215_v18 = vld [vmem:[#allocation5 + $0x38] sm:$0xff]  ;;  %v213_v20 = vld [vmem:[#allocation5 + $0x28] sm:$0xff]  ;;  %v153_v31 = vsel %vm149_vm0, %v148_v27, %v145_v26  ;;  %v151_v44 = vsel %vm149_vm0, %v146_v36, %v147_v37  ;;  %v169_v46 = vrot.slane %v888_v8, 1  ;;  %v150_v48 = vsel %vm149_vm0, %v147_v37, %v148_v27 }
  0x15   :  { %287 = vmatpush.msra.mxu1 %v229_v11  ;;  %v214_v19 = vld [vmem:[#allocation5 + $0x30] sm:$0xff]  ;;  %v212_v21 = vld [vmem:[#allocation5 + $0x20] sm:$0xff]  ;;  %v211_v22 = vld [vmem:[#allocation5 + $0x18] sm:$0xff]  ;;  %v96_v41 = vand.u32 15, %v82_v39  ;;  %v84_v49 = vadd.s32 24, %v896_v28  ;;  %v89_v50 = vand.u32 15, %v896_v28 }
  0x16   :  { %251 = vmatpush.msra.mxu0 %v220_v5  ;;  %v210_v23 = vld [vmem:[#allocation5 + $0x10] sm:$0xff]  ;;  %v209_v24 = vld [vmem:[#allocation5 + $0x8] sm:$0xff]  ;;  %v208_v32 = vld [vmem:[#allocation5] sm:$0xff]  ;;  %v171_v47 = vsel %vm170_vm1, %v168_v38, %v169_v46  ;;  %v174_v53 = vsel %vm170_vm1, %v169_v46, %v166_v29  ;;  %v83_v59 = vadd.s32 16, %v896_v28 }
  0x17   :  { %193 = vrot.lane.b32.xlu0 %v886_v7, %s806_s5  ;;  %197 = vrot.lane.b32.xlu1 %v888_v8, %s806_s5  ;;  %v225_v33 = vld [vmem:[#allocation5 + $0x88] sm:$0xff]  ;;  %v224_v34 = vld [vmem:[#allocation5 + $0x80] sm:$0xff]  ;;  %vm913_vm3 = vcmp.ge.s32.totalorder %v96_v41, 15  ;;  %v110_v51 = vand.u32 15, %v84_v49  ;;  %vm938_vm5 = vcmp.lt.s32.totalorder %v89_v50, 1 }
  0x18   :  { %252 = vmatpush.msra.mxu0 %v219_v10  ;;  %288 = vmatpush.msra.mxu1 %v228_v13  ;;  %v184_v45 = vsel %vm913_vm3, 0.0, %v172_v43  ;;  %v162_v56 = vsel %vm938_vm5, 0.0, %v153_v31  ;;  %v103_v60 = vand.u32 15, %v83_v59  ;;  %v693_v9 = vld [vmem:[%s1066_s2] ss:$0 sm:$0xff]  ;;  %s807_s2 = smov 16   ;;  %vm660_vm11 = vmneg %vm938_vm5 }
  0x19   :  { %vm932_vm4 = vcmp.ge.s32.totalorder %v110_v51, 15  ;;  %v443_v59 = vld [vmem:[#allocation7 + $0xf8] sm:$0xff]  ;;  %vm664_vm12 = vmneg %vm913_vm3 }
  0x1a   :  { %253 = vmatpush.msra.mxu0 %v218_v12  ;;  %289 = vmatpush.msra.mxu1 %v227_v15  ;;  %v186_v55 = vsel %vm932_vm4, 0.0, %v174_v53  ;;  %vm950_vm6 = vcmp.lt.s32.totalorder %v103_v60, 1  ;;  %v442_v60 = vld [vmem:[#allocation7 + $0xf0] sm:$0xff]  ;;  %vm666_vm14 = vmneg %vm932_vm4  ;;  %v694_v52 = vld [vmem:[%s1070_s6] ss:$0 sm:$0xff] }
  0x1b   :  { %v164_v1 = vsel %vm950_vm6, 0.0, %v151_v44  ;;  %493 = vmatpush.msra.mxu3 %v443_v59  ;;  %v444_v59 = vld [vmem:[#allocation7 + $0x100] sm:$0xff]  ;;  %vm662_vm13 = vmneg %vm950_vm6 }
  0x1c   :  { %254 = vmatpush.msra.mxu0 %v217_v14  ;;  %290 = vmatpush.msra.mxu1 %v226_v17 }
  0x1d   :  { %494 = vmatpush.msra.mxu3 %v442_v60 }
  0x1e   :  { %255 = vmatpush.msra.mxu0 %v216_v16  ;;  %291 = vmatpush.msra.mxu1 %v225_v33 }
  0x20   :  { %256 = vmatpush.msra.mxu0 %v215_v18  ;;  %292 = vmatpush.msra.mxu1 %v224_v34 }
  0x21   :  { %656 = vmatmul.msk.f32.vlgmr.msra.gmra.mxu1 %vm203_vm2, %v173_v35 }
  0x22   :  { %257 = vmatpush.msra.mxu0 %v214_v19 }
  0x24   :  { %258 = vmatpush.msra.mxu0 %v213_v20 }
  0x26   :  { %259 = vmatpush.msra.mxu0 %v212_v21 }
  0x28   :  { %260 = vmatpush.msra.mxu0 %v211_v22 }
  0x29   :  { %657 = vmatmul.msk.f32.gmra.mxu1 %vm203_vm2, %v184_v45 }
  0x2a   :  { %261 = vmatpush.msra.mxu0 %v210_v23 }
  0x2c   :  { %262 = vmatpush.msra.mxu0 %v209_v24 }
  0x2e   :  { %263 = vmatpush.msra.mxu0 %v208_v32 }
  0x31   :  { %658 = vmatmul.msk.f32.gmra.mxu1 %vm203_vm2, %v171_v47 }
  0x39   :  { %659 = vmatmul.msk.f32.gmra.mxu1 %vm203_vm2, %v186_v55 }
  0x81   :  { %v192_v57 = vpop.permute.xlu0 %191  ;;  %v196_v0 = vpop.permute.xlu1 %195 }
  0x82   :  { %v204_v58 = vsel %vm203_vm2, %v162_v56, %v192_v57  ;;  %v206_v2 = vsel %vm203_vm2, %v164_v1, %v196_v0  ;;  %v441_v0 = vld [vmem:[#allocation7 + $0xe8] sm:$0xff]  ;;  %v426_v1 = vld [vmem:[#allocation7 + $0x70] sm:$0xff] }
  0x83   :  { %264 = vmatmul.f32.vlgmr.msra.gmra.mxu0 %v204_v58  ;;  %495 = vmatpush.msra.mxu3 %v441_v0 }
  0x89   :  { %v194_v61 = vpop.permute.xlu0 %193  ;;  %v198_v3 = vpop.permute.xlu1 %197 }
  0x8a   :  { %v205_v62 = vsel %vm203_vm2, %v152_v40, %v194_v61  ;;  %v207_v4 = vsel %vm203_vm2, %v150_v48, %v198_v3  ;;  %v427_v61 = vld [vmem:[#allocation7 + $0x78] sm:$0xff]  ;;  %v440_v3 = vld [vmem:[#allocation7 + $0xe0] sm:$0xff] }
  0x8b   :  { %267 = vmatmul.f32.gmra.mxu0 %v205_v62  ;;  %v459_v62 = vld [vmem:[#allocation7 + $0x178] sm:$0xff]  ;;  %464 = vmatpush.msra.mxu2 %v427_v61 }
  0x8c   :  { %522 = vmatpush.msrb.mxu0 %v459_v62  ;;  %668 = vmatpush.msrb.mxu1 %v459_v62 }
  0x8d   :  { %465 = vmatpush.msra.mxu2 %v426_v1  ;;  %496 = vmatpush.msra.mxu3 %v440_v3 }
  0x93   :  { %270 = vmatmul.f32.gmra.mxu0 %v206_v2  ;;  %v458_v2 = vld [vmem:[#allocation7 + $0x170] sm:$0xff] }
  0x94   :  { %523 = vmatpush.msrb.mxu0 %v458_v2  ;;  %669 = vmatpush.msrb.mxu1 %v458_v2 }
  0x9b   :  { %273 = vmatmul.f32.gmra.mxu0 %v207_v4  ;;  %v425_v4 = vld [vmem:[#allocation7 + $0x68] sm:$0xff] }
  0x9c   :  { %466 = vmatpush.msra.mxu2 %v425_v4  ;;  %v353_v4 = vld [vmem:[%s1067_s3] sm:$0x1] }
  0x9e   :  { %v294_v5 = vpop.f32.mrf.mxu1 }
  0xa6   :  { %v297_v7 = vpop.f32.mrf.mxu1 }
  0xae   :  { %v300_v11 = vpop.f32.mrf.mxu1 }
  0xb6   :  { %v303_v22 = vpop.f32.mrf.mxu1 }
 0x100   :  { %v265_v6 = vpop.f32.mrf.mxu0 }
 0x101   :  { %v266_v12 = vadd.f32 %v693_v9, %v265_v6  ;;  %v439_v6 = vld [vmem:[#allocation7 + $0xd8] sm:$0xff] }
 0x102   :  { %497 = vmatpush.msra.mxu3 %v439_v6 }
 0x103   :  { %v295_v16 = vadd.f32 %v294_v5, %v266_v12  ;;  %v457_v5 = vld [vmem:[#allocation7 + $0x168] sm:$0xff] }
 0x104   :  { %524 = vmatpush.msrb.mxu0 %v457_v5  ;;  %670 = vmatpush.msrb.mxu1 %v457_v5  ;;  %v437_v12 = vld [vmem:[#allocation7 + $0xc8] sm:$0xff] }
 0x105   :  { %v963_v19 = vmax.f32 %v295_v16, 0.0 }
 0x107   :  { %v319_v25 = vmul.f32 %v963_v19, %v963_v19 }
 0x108   :  { %v268_v8 = vpop.f32.mrf.mxu0 }
 0x109   :  { %v269_v10 = vadd.f32 %v693_v9, %v268_v8  ;;  %v456_v8 = vld [vmem:[#allocation7 + $0x160] sm:$0xff] }
 0x10a   :  { %525 = vmatpush.msrb.mxu0 %v456_v8  ;;  %671 = vmatpush.msrb.mxu1 %v456_v8 }
 0x10b   :  { %v298_v14 = vadd.f32 %v297_v7, %v269_v10  ;;  %v424_v7 = vld [vmem:[#allocation7 + $0x60] sm:$0xff]  ;;  %v423_v10 = vld [vmem:[#allocation7 + $0x58] sm:$0xff] }
 0x10c   :  { %467 = vmatpush.msra.mxu2 %v424_v7  ;;  %v371_v7 = vld [vmem:[%s1068_s4] sm:$0x1] }
 0x10d   :  { %v961_v18 = vmax.f32 %v298_v14, 0.0  ;;  %v422_v14 = vld [vmem:[#allocation7 + $0x50] sm:$0xff] }
 0x10e   :  { %468 = vmatpush.msra.mxu2 %v423_v10 }
 0x10f   :  { %v320_v23 = vmul.f32 %v961_v18, %v961_v18  ;;  %v310_v26 = vadd.f32 %v961_v18, %v963_v19 }
 0x110   :  { %v271_v13 = vpop.f32.mrf.mxu0  ;;  %469 = vmatpush.msra.mxu2 %v422_v14 }
 0x111   :  { %v272_v15 = vadd.f32 %v693_v9, %v271_v13  ;;  %v323_v30 = vadd.f32 %v320_v23, %v319_v25  ;;  %v420_v25 = vld [vmem:[#allocation7 + $0x40] sm:$0xff] }
 0x113   :  { %v301_v17 = vadd.f32 %v300_v11, %v272_v15  ;;  %v455_v11 = vld [vmem:[#allocation7 + $0x158] sm:$0xff]  ;;  %v454_v15 = vld [vmem:[#allocation7 + $0x150] sm:$0xff] }
 0x114   :  { %526 = vmatpush.msrb.mxu0 %v455_v11  ;;  %672 = vmatpush.msrb.mxu1 %v455_v11 }
 0x115   :  { %v965_v20 = vmax.f32 %v301_v17, 0.0  ;;  %v436_v17 = vld [vmem:[#allocation7 + $0xc0] sm:$0xff] }
 0x116   :  { %527 = vmatpush.msrb.mxu0 %v454_v15  ;;  %673 = vmatpush.msrb.mxu1 %v454_v15 }
 0x117   :  { %v321_v27 = vmul.f32 %v965_v20, %v965_v20  ;;  %v311_v31 = vadd.f32 %v310_v26, %v965_v20  ;;  %v452_v26 = vld [vmem:[#allocation7 + $0x140] sm:$0xff] }
 0x118   :  { %v274_v21 = vpop.f32.mrf.mxu0 }
 0x119   :  { %v275_v24 = vadd.f32 %v693_v9, %v274_v21  ;;  %v324_v33 = vadd.f32 %v323_v30, %v321_v27  ;;  %v438_v9 = vld [vmem:[#allocation7 + $0xd0] sm:$0xff]  ;;  %v421_v21 = vld [vmem:[#allocation7 + $0x48] sm:$0xff]  ;;  %v419_v30 = vld [vmem:[#allocation7 + $0x38] sm:$0xff] }
 0x11a   :  { %498 = vmatpush.msra.mxu3 %v438_v9  ;;  %470 = vmatpush.msra.mxu2 %v421_v21 }
 0x11b   :  { %v304_v29 = vadd.f32 %v303_v22, %v275_v24  ;;  %v453_v22 = vld [vmem:[#allocation7 + $0x148] sm:$0xff]  ;;  %v435_v24 = vld [vmem:[#allocation7 + $0xb8] sm:$0xff] }
 0x11c   :  { %499 = vmatpush.msra.mxu3 %v437_v12  ;;  %528 = vmatpush.msrb.mxu0 %v453_v22 }
 0x11d   :  { %v976_v32 = vmax.f32 %v304_v29, 0.0  ;;  %674 = vmatpush.msrb.mxu1 %v453_v22  ;;  %471 = vmatpush.msra.mxu2 %v420_v25  ;;  %v434_v29 = vld [vmem:[#allocation7 + $0xb0] sm:$0xff] }
 0x11e   :  { %500 = vmatpush.msra.mxu3 %v436_v17  ;;  %529 = vmatpush.msrb.mxu0 %v452_v26 }
 0x11f   :  { %v312_v34 = vadd.f32 %v311_v31, %v976_v32  ;;  %v322_v35 = vmul.f32 %v976_v32, %v976_v32  ;;  %675 = vmatpush.msrb.mxu1 %v452_v26  ;;  %v451_v31 = vld [vmem:[#allocation7 + $0x138] sm:$0xff]  ;;  %472 = vmatpush.msra.mxu2 %v419_v30 }
 0x120   :  { %501 = vmatpush.msra.mxu3 %v435_v24  ;;  %530 = vmatpush.msrb.mxu0 %v451_v31 }
 0x121   :  { %v313_v36 = vrot.slane %v312_v34, 4  ;;  %v325_v37 = vadd.f32 %v324_v33, %v322_v35  ;;  %676 = vmatpush.msrb.mxu1 %v451_v31  ;;  %v418_v35 = vld [vmem:[#allocation7 + $0x30] sm:$0xff] }
 0x122   :  { %502 = vmatpush.msra.mxu3 %v434_v29  ;;  %473 = vmatpush.msra.mxu2 %v418_v35 }
 0x123   :  { %v314_v38 = vadd.f32 %v313_v36, %v312_v34  ;;  %v326_v39 = vrot.slane %v325_v37, 4  ;;  %v433_v34 = vld [vmem:[#allocation7 + $0xa8] sm:$0xff]  ;;  %v450_v36 = vld [vmem:[#allocation7 + $0x130] sm:$0xff] }
 0x124   :  { %503 = vmatpush.msra.mxu3 %v433_v34  ;;  %531 = vmatpush.msrb.mxu0 %v450_v36 }
 0x125   :  { %v315_v40 = vrot.slane %v314_v38, 2  ;;  %v327_v41 = vadd.f32 %v326_v39, %v325_v37  ;;  %677 = vmatpush.msrb.mxu1 %v450_v36  ;;  %v417_v39 = vld [vmem:[#allocation7 + $0x28] sm:$0xff] }
 0x126   :  { %474 = vmatpush.msra.mxu2 %v417_v39 }
 0x127   :  { %v316_v43 = vadd.f32 %v315_v40, %v314_v38  ;;  %v328_v44 = vrot.slane %v327_v41, 2  ;;  %v432_v38 = vld [vmem:[#allocation7 + $0xa0] sm:$0xff]  ;;  %v449_v40 = vld [vmem:[#allocation7 + $0x128] sm:$0xff] }
 0x128   :  { %504 = vmatpush.msra.mxu3 %v432_v38  ;;  %532 = vmatpush.msrb.mxu0 %v449_v40 }
 0x129   :  { %v317_v45 = vrot.slane %v316_v43, 1  ;;  %v329_v46 = vadd.f32 %v328_v44, %v327_v41  ;;  %678 = vmatpush.msrb.mxu1 %v449_v40  ;;  %v416_v44 = vld [vmem:[#allocation7 + $0x20] sm:$0xff] }
 0x12a   :  { %475 = vmatpush.msra.mxu2 %v416_v44 }
 0x12b   :  { %v330_v47 = vrot.slane %v329_v46, 1  ;;  %v318_v48 = vadd.f32 %v317_v45, %v316_v43  ;;  %v431_v43 = vld [vmem:[#allocation7 + $0x98] sm:$0xff]  ;;  %v448_v45 = vld [vmem:[#allocation7 + $0x120] sm:$0xff] }
 0x12c   :  { %505 = vmatpush.msra.mxu3 %v431_v43  ;;  %533 = vmatpush.msrb.mxu0 %v448_v45 }
 0x12d   :  { %v331_v49 = vadd.f32 %v330_v47, %v329_v46  ;;  %v430_v47 = vld [vmem:[#allocation7 + $0x90] sm:$0xff]  ;;  %679 = vmatpush.msrb.mxu1 %v448_v45 }
 0x12e   :  { %506 = vmatpush.msra.mxu3 %v430_v47 }
 0x12f   :  { %v333_v50 = vsel %vm332_vm7, %v318_v48, %v331_v49  ;;  %v415_v48 = vld [vmem:[#allocation7 + $0x18] sm:$0xff] }
 0x130   :  { %334 = vrot.lane.b32.xlu2 %v333_v50, %s803_s18  ;;  %v447_v49 = vld [vmem:[#allocation7 + $0x118] sm:$0xff]  ;;  %476 = vmatpush.msra.mxu2 %v415_v48 }
 0x131   :  { %534 = vmatpush.msrb.mxu0 %v447_v49  ;;  %680 = vmatpush.msrb.mxu1 %v447_v49 }
 0x18a   :  { %v335_v51 = vpop.permute.xlu2 %334 }
 0x18b   :  { %v336_v53 = vadd.f32 %v335_v51, %v333_v50  ;;  %v429_v50 = vld [vmem:[#allocation7 + $0x88] sm:$0xff]  ;;  %v414_v51 = vld [vmem:[#allocation7 + $0x10] sm:$0xff] }
 0x18c   :  { %507 = vmatpush.msra.mxu3 %v429_v50  ;;  %477 = vmatpush.msra.mxu2 %v414_v51 }
 0x18d   :  { %337 = vrot.lane.b32.xlu2 %v336_v53, %s807_s2 }
 0x1e7   :  { %v338_v55 = vpop.permute.xlu2 %337 }
 0x1e8   :  { %v339_v56 = vadd.f32 %v338_v55, %v336_v53  ;;  %v446_v53 = vld [vmem:[#allocation7 + $0x110] sm:$0xff]  ;;  %v428_v55 = vld [vmem:[#allocation7 + $0x80] sm:$0xff] }
 0x1e9   :  { %535 = vmatpush.msrb.mxu0 %v446_v53  ;;  %681 = vmatpush.msrb.mxu1 %v446_v53 }
 0x1ea   :  { %340 = vrot.lane.b32.xlu0 %v339_v56, %s808_s26  ;;  %508 = vmatpush.msra.mxu3 %v428_v55 }
 0x25c   :  { %v341_v57 = vpop.permute.xlu0 %340 }
 0x25d   :  { %v342_v58 = vadd.f32 %v341_v57, %v339_v56  ;;  %v413_v56 = vld [vmem:[#allocation7 + $0x8] sm:$0xff] }
 0x25e   :  { %v445_v57 = vld [vmem:[#allocation7 + $0x108] sm:$0xff]  ;;  %478 = vmatpush.msra.mxu2 %v413_v56 }
 0x25f   :  { %343 = vrot.lane.b32.xlu1 %v342_v58, %s806_s5  ;;  %536 = vmatpush.msrb.mxu0 %v445_v57 }
 0x260   :  { %682 = vmatpush.msrb.mxu1 %v445_v57 }
 0x261   :  { %537 = vmatpush.msrb.mxu0 %v444_v59 }
 0x262   :  { %683 = vmatpush.msrb.mxu1 %v444_v59 }
 0x2d1   :  { %v344_v13 = vpop.permute.xlu1 %343 }
 0x2d2   :  { %v345_v16 = vadd.f32 %v344_v13, %v342_v58  ;;  %v412_v58 = vld [vmem:[#allocation7] sm:$0xff] }
 0x2d3   :  { %479 = vmatpush.msra.mxu2 %v412_v58 }
 0x2d4   :  { %v986_v23 = vmul.f32 0.001953125, %v345_v16 }
 0x2d6   :  { %v347_v27 = vmul.f32 %v986_v23, %v986_v23 }
 0x2d8   :  { %v349_v33 = vrot.slane %v347_v27, 7 }
 0x2da   :  { %v351_v37 = vsub.f32 %v986_v23, %v349_v33 }
 0x2dc   :  { %v352_v41 = vmax.f32 %v351_v37, 0.0 }
 0x2de   :  { %v354_v46 = vadd.f32 1e-05, %v352_v41 }
 0x2e0   :  { %695 = vrsqrt.f32 %v354_v46  ;;  %vm361_vm9 = vweird.f32 %v354_v46 }
 0x2e6   :  { %v696_v60 = vpop.eup %695 }
 0x2e7   :  { %v356_v61 = vmul.f32 %v696_v60, %v354_v46  ;;  %vm362_vm8 = vweird.f32 %v696_v60 }
 0x2e8   :  { %vm363_vm10 = vmor %vm361_vm9, %vm362_vm8 }
 0x2e9   :  { %v357_v62 = vmul.f32 %v696_v60, %v356_v61 }
 0x2eb   :  { %v358_v0 = vmul.f32 0.5, %v357_v62 }
 0x2ed   :  { %v359_v1 = vsub.f32 1.5, %v358_v0 }
 0x2ef   :  { %v360_v2 = vmul.f32 %v696_v60, %v359_v1 }
 0x2f1   :  { %v364_v3 = vsel %vm363_vm10, %v696_v60, %v360_v2 }
 0x2f2   :  { %366 = vst [vmem:[#allocation1] sm:$0xff] %v364_v3 }
 0x2f9   :  { %v368_v5 = vld [vmem:[#allocation1 + $0x1] ss:$9 sm:$0xff] }
 0x2fa   :  { %v370_v6 = vmul.f32 %v368_v5, %v353_v4 }
 0x2fc   :  { %v372_v8 = vmul.f32 %v370_v6, %v986_v23  ;;  %v375_v9 = vperm.slane %v370_v6, 0 }
 0x2fe   :  { %v373_v10 = vsub.f32 %v371_v7, %v372_v8  ;;  %v377_v11 = vmul.f32 %v375_v9, %v963_v19  ;;  %v380_v13 = vmul.f32 %v375_v9, %v976_v32  ;;  %v378_v14 = vmul.f32 %v375_v9, %v961_v18 }
 0x2ff   :  { %v379_v15 = vmul.f32 %v375_v9, %v965_v20 }
 0x300   :  { %v382_v12 = vperm.slane %v373_v10, 0 }
 0x302   :  { %v384_v16 = vadd.f32 %v382_v12, %v377_v11  ;;  %v387_v17 = vadd.f32 %v382_v12, %v380_v13  ;;  %v385_v21 = vadd.f32 %v382_v12, %v378_v14  ;;  %v386_v22 = vadd.f32 %v382_v12, %v379_v15 }
 0x304   :  { %509 = vmatmul.f32.vlgmr.msra.gmra.mxu3 %v384_v16  ;;  %v388_v24 = vrot.slane %v384_v16, 7  ;;  %v391_v25 = vrot.slane %v387_v17, 7  ;;  %v400_v23 = vrot.slane %v384_v16, 1  ;;  %v401_v26 = vrot.slane %v385_v21, 1 }
 0x305   :  { %v402_v19 = vrot.slane %v386_v22, 1  ;;  %v389_v54 = vrot.slane %v385_v21, 7  ;;  %v403_v27 = vrot.slane %v387_v17, 1  ;;  %v390_v30 = vrot.slane %v386_v22, 7 }
 0x306   :  { %v395_v18 = vsel %vm149_vm0, %v391_v25, %v388_v24  ;;  %v406_v20 = vsel %vm170_vm1, %v400_v23, %v401_v26 }
 0x307   :  { %661 = vmatmul.msk.f32.vlgmr.msra.gmra.mxu2 %vm660_vm11, %v395_v18  ;;  %538 = vmatmul.f32.vlgmr.msrb.gmra.mxu0 %v406_v20  ;;  %v405_v32 = vsel %vm170_vm1, %v401_v26, %v402_v19  ;;  %v394_v29 = vsel %vm149_vm0, %v388_v24, %v389_v54  ;;  %v404_v42 = vsel %vm170_vm1, %v402_v19, %v403_v27 }
 0x308   :  { %665 = vmatmul.msk.f32.vlgmr.msrb.gmra.mxu1 %vm664_vm12, %v405_v32  ;;  %v393_v31 = vsel %vm149_vm0, %v389_v54, %v390_v30  ;;  %v407_v33 = vsel %vm170_vm1, %v403_v27, %v400_v23  ;;  %v392_v34 = vsel %vm149_vm0, %v390_v30, %v391_v25 }
 0x30c   :  { %512 = vmatmul.f32.gmra.mxu3 %v385_v21 }
 0x30f   :  { %483 = vmatmul.f32.gmra.mxu2 %v394_v29 }
 0x310   :  { %544 = vmatmul.f32.gmra.mxu1 %v404_v42 }
 0x314   :  { %515 = vmatmul.f32.gmra.mxu3 %v386_v22 }
 0x317   :  { %663 = vmatmul.msk.f32.gmra.mxu2 %vm662_vm13, %v393_v31 }
 0x318   :  { %667 = vmatmul.msk.f32.gmra.mxu1 %vm666_vm14, %v407_v33 }
 0x31c   :  { %518 = vmatmul.f32.gmra.mxu3 %v387_v17 }
 0x31f   :  { %489 = vmatmul.f32.gmra.mxu2 %v392_v34 }
 0x384   :  { %v539_v49 = vpop.f32.mrf.mxu0 }
 0x385   :  { %v542_v37 = vpop.f32.mrf.mxu1 }
 0x387   :  { %v510_v35 = vpop.f32.mrf.mxu3 }
 0x38a   :  { %v481_v36 = vpop.f32.mrf.mxu2 }
 0x38b   :  { %v482_v40 = vadd.f32 %v694_v52, %v481_v36 }
 0x38d   :  { %v511_v45 = vadd.f32 %v510_v35, %v482_v40  ;;  %v545_v47 = vpop.f32.mrf.mxu1 }
 0x38f   :  { %v513_v63 = vpop.f32.mrf.mxu3  ;;  %v540_v50 = vadd.f32 %v539_v49, %v511_v45 }
 0x391   :  { %v1031_v56 = vmax.f32 %v540_v50, 0.0 }
 0x392   :  { %v484_v38 = vpop.f32.mrf.mxu2 }
 0x393   :  { %v485_v39 = vadd.f32 %v694_v52, %v484_v38  ;;  %v564_v0 = vmul.f32 %v1031_v56, %v1031_v56 }
 0x395   :  { %v514_v41 = vadd.f32 %v513_v63, %v485_v39  ;;  %v548_v62 = vpop.f32.mrf.mxu1 }
 0x397   :  { %v516_v43 = vpop.f32.mrf.mxu3  ;;  %v543_v28 = vadd.f32 %v542_v37, %v514_v41 }
 0x399   :  { %v1029_v53 = vmax.f32 %v543_v28, 0.0 }
 0x39a   :  { %v487_v44 = vpop.f32.mrf.mxu2 }
 0x39b   :  { %v488_v46 = vadd.f32 %v694_v52, %v487_v44  ;;  %v565_v60 = vmul.f32 %v1029_v53, %v1029_v53  ;;  %v555_v1 = vadd.f32 %v1029_v53, %v1031_v56 }
 0x39d   :  { %v517_v48 = vadd.f32 %v516_v43, %v488_v46  ;;  %v568_v4 = vadd.f32 %v565_v60, %v564_v0  ;;  %v597_v43 = vld [vmem:[%s1071_s7] sm:$0x1]  ;;  %s809_s7 = smov [#allocation8]  }
 0x39e   :  { %v615_v46 = vld [vmem:[%s1072_s8] sm:$0x1]  ;;  %s640_s13 = sshll.u32 %s809_s7, 4  ;;  %s642_s8 = sshll.u32 %s1073_s9, 4  ;;  %s641_s13 = int_to_ptr.vmem [resolvable:$true] %s640_s13  ;;  %s643_s8 = int_to_ptr.hbm [resolvable:$true] %s642_s8 }
 0x39f   :  { %v546_v51 = vadd.f32 %v545_v47, %v517_v48  ;;  %v519_v59 = vpop.f32.mrf.mxu3 }
 0x3a1   :  { %v1033_v57 = vmax.f32 %v546_v51, 0.0 }
 0x3a2   :  { %v490_v55 = vpop.f32.mrf.mxu2 }
 0x3a3   :  { %v491_v58 = vadd.f32 %v694_v52, %v490_v55  ;;  %v566_v2 = vmul.f32 %v1033_v57, %v1033_v57  ;;  %v556_v5 = vadd.f32 %v555_v1, %v1033_v57 }
 0x3a5   :  { %v520_v61 = vadd.f32 %v519_v59, %v491_v58  ;;  %v569_v7 = vadd.f32 %v568_v4, %v566_v2 }
 0x3a7   :  { %v549_v3 = vadd.f32 %v548_v62, %v520_v61 }
 0x3a9   :  { %v554_v6 = vmax.f32 %v549_v3, 0.0 }
 0x3ab   :  { %v557_v8 = vadd.f32 %v556_v5, %v554_v6  ;;  %v567_v9 = vmul.f32 %v554_v6, %v554_v6 }
 0x3ad   :  { %v558_v10 = vrot.slane %v557_v8, 4  ;;  %v570_v11 = vadd.f32 %v569_v7, %v567_v9 }
 0x3af   :  { %v559_v12 = vadd.f32 %v558_v10, %v557_v8  ;;  %v571_v13 = vrot.slane %v570_v11, 4 }
 0x3b1   :  { %v560_v14 = vrot.slane %v559_v12, 2  ;;  %v572_v15 = vadd.f32 %v571_v13, %v570_v11 }
 0x3b3   :  { %v561_v16 = vadd.f32 %v560_v14, %v559_v12  ;;  %v573_v17 = vrot.slane %v572_v15, 2 }
 0x3b5   :  { %v562_v21 = vrot.slane %v561_v16, 1  ;;  %v574_v22 = vadd.f32 %v573_v17, %v572_v15 }
 0x3b7   :  { %v575_v24 = vrot.slane %v574_v22, 1  ;;  %v563_v25 = vadd.f32 %v562_v21, %v561_v16 }
 0x3b9   :  { %v576_v23 = vadd.f32 %v575_v24, %v574_v22 }
 0x3bb   :  { %v577_v26 = vsel %vm332_vm7, %v563_v25, %v576_v23 }
 0x3bc   :  { %578 = vrot.lane.b32.xlu2 %v577_v26, %s803_s18 }
 0x416   :  { %v579_v19 = vpop.permute.xlu2 %578 }
 0x417   :  { %v580_v18 = vadd.f32 %v579_v19, %v577_v26 }
 0x419   :  { %581 = vrot.lane.b32.xlu0 %v580_v18, %s807_s2 }
 0x48b   :  { %v582_v20 = vpop.permute.xlu0 %581 }
 0x48c   :  { %v583_v32 = vadd.f32 %v582_v20, %v580_v18 }
 0x48e   :  { %584 = vrot.lane.b32.xlu1 %v583_v32, %s808_s26 }
 0x500   :  { %v585_v54 = vpop.permute.xlu1 %584 }
 0x501   :  { %v586_v27 = vadd.f32 %v585_v54, %v583_v32 }
 0x503   :  { %587 = vrot.lane.b32.xlu2 %v586_v27, %s806_s5 }
 0x55d   :  { %v588_v29 = vpop.permute.xlu2 %587 }
 0x55e   :  { %v589_v42 = vadd.f32 %v588_v29, %v586_v27 }
 0x560   :  { %v590_v30 = vmul.f32 0.001953125, %v589_v42 }
 0x562   :  { %v591_v31 = vmul.f32 %v590_v30, %v590_v30 }
 0x564   :  { %v593_v33 = vrot.slane %v591_v31, 7 }
 0x566   :  { %v595_v34 = vsub.f32 %v590_v30, %v593_v33 }
 0x568   :  { %v596_v35 = vmax.f32 %v595_v34, 0.0 }
 0x56a   :  { %v598_v36 = vadd.f32 1e-05, %v596_v35 }
 0x56c   :  { %697 = vrsqrt.f32 %v598_v36  ;;  %vm605_vm0 = vweird.f32 %v598_v36 }
 0x572   :  { %v698_v63 = vpop.eup %697 }
 0x573   :  { %v600_v37 = vmul.f32 %v698_v63, %v598_v36  ;;  %vm606_vm15 = vweird.f32 %v698_v63 }
 0x574   :  { %vm607_vm1 = vmor %vm605_vm0, %vm606_vm15 }
 0x575   :  { %v601_v38 = vmul.f32 %v698_v63, %v600_v37 }
 0x577   :  { %v602_v52 = vmul.f32 0.5, %v601_v38 }
 0x579   :  { %v603_v39 = vsub.f32 1.5, %v602_v52 }
 0x57b   :  { %v604_v40 = vmul.f32 %v698_v63, %v603_v39 }
 0x57d   :  { %v608_v41 = vsel %vm607_vm1, %v698_v63, %v604_v40 }
 0x57e   :  { %610 = vst [vmem:[#allocation1] sm:$0xff] %v608_v41 }
 0x585   :  { %v612_v44 = vld [vmem:[#allocation1 + $0x1] ss:$9 sm:$0xff] }
 0x586   :  { %v614_v45 = vmul.f32 %v612_v44, %v597_v43 }
 0x588   :  { %v616_v47 = vmul.f32 %v614_v45, %v590_v30  ;;  %v619_v28 = vperm.slane %v614_v45, 0 }
 0x58a   :  { %v617_v48 = vsub.f32 %v615_v46, %v616_v47  ;;  %v621_v50 = vmul.f32 %v619_v28, %v1031_v56  ;;  %v622_v51 = vmul.f32 %v619_v28, %v1029_v53  ;;  %v623_v55 = vmul.f32 %v619_v28, %v1033_v57 }
 0x58b   :  { %v624_v58 = vmul.f32 %v619_v28, %v554_v6 }
 0x58c   :  { %v626_v49 = vperm.slane %v617_v48, 0 }
 0x58e   :  { %v628_v59 = vadd.f32 %v626_v49, %v621_v50  ;;  %v629_v60 = vadd.f32 %v626_v49, %v622_v51  ;;  %v630_v61 = vadd.f32 %v626_v49, %v623_v55  ;;  %v631_v62 = vadd.f32 %v626_v49, %v624_v58 }
 0x590   :  { %632 = vst [vmem:[#allocation8] sm:$0xff] %v628_v59 }
 0x591   :  { %633 = vst [vmem:[#allocation8 + $0x8] sm:$0xff] %v629_v60 }
 0x592   :  { %634 = vst [vmem:[#allocation8 + $0x10] sm:$0xff] %v630_v61 }
 0x593   :  { %635 = vst [vmem:[#allocation8 + $0x18] sm:$0xff] %v631_v62 }
 0x594   :  { %648 = dma.vmem_to_hbm [thread:$0]  %s641_s13, 512, %s643_s8, [#allocation4], %s802_s17, %s802_s17, %s803_s18  }
 0x595   :  { %799 = dma.done.wait [#allocation4], 512  }
 0x596   :  { %800 = vsyncadd [#allocation4], 4294966784 }
 0x597   :  { %653 = vsyncpa [#allocation3], 1 }
 0x598   :  { %654 = vsyncpa [#allocation6], 1 }
 0x599   :  { %655 = vsyncpa [#allocation4], 1 }

</bundles_post_ra>
